<compile_context>
chip_gen: v5e
topology: v5e:2x2
jax: 0.10.0
libtpu: 0.0.40
codegen_flags: <defaults>
</compile_context>

<pallas_src>
import functools

import jax
import jax.numpy as jnp
from jax import lax
from jax.experimental import pallas as pl
from jax.experimental.pallas import tpu as pltpu

_NEG = float(-1e30)   # large negative but finite (avoids inf-inf NaNs)


def _round_up(x, m):
    return ((x + m - 1) // m) * m


def _pad_to(x, shape):
    pads = tuple((0, t - s) for s, t in zip(x.shape, shape))
    if all(p == (0, 0) for p in pads):
        return x
    return jnp.pad(x, pads)


def _vmem_capacity_bytes():
    """Physical VMEM per TensorCore; conservative 64 MiB fallback (v7x)."""
    try:
        info = pltpu.get_tpu_info()
        cap = getattr(info, "vmem_capacity_bytes", None)
        if cap:
            return int(cap)
    except Exception:
        pass
    return 64 << 20


def _vmem_budget(tm, tn, d, feat_bytes, contrast_rows, mask_streamed):
    """Generous upper bound on kernel VMEM use (double-buffered tiles + temps)."""
    b = 2 * tm * d * feat_bytes                      # anchor tiles
    b += 2 * contrast_rows * d * feat_bytes          # contrast tiles / resident copy
    b += 8 * tm * tn * 4                             # f32 [tm,tn] temporaries
    if mask_streamed:
        b += 2 * tm * tn * 2                         # bf16 mask tiles
    b += 2 * (_round_up(tm, 8) * 128 + 8 * _round_up(tn, 128)) * 4   # id blocks
    b += 6 * _round_up(tm, 8) * 128 * 4              # scratch accumulators + out block
    b += 2 << 20                                     # Mosaic internal scratch / headroom
    return b


def _tile_body(n_valid, has_pad, resident_tn, loss_scale, pos_fn,
               a_ref, c_ref, out_ref, m_ref, l_ref, spl_ref, sp_ref):
    """Shared per-tile work.  pos_fn(keep_or_None) -> [tm, tn] f32 positives."""
    i = pl.program_id(0)
    j = pl.program_id(1)
    num_j = pl.num_programs(1)

    if resident_tn is None:
        c = c_ref[...]                               # streamed (tn, D) tile
        tn = c.shape[0]
    else:
        tn = resident_tn                             # slice from resident (n_pad, D)
        start = pl.multiple_of(j * tn, 128)
        c = c_ref[pl.ds(start, tn), :]

    # [tm, D] x [tn, D] -> [tm, tn]; contract the feature dim of both operands
    # (flash Q.K^T form) so the MXU is fed without transposing the contrast tile.
    # inv_t is already folded into the anchor features.
    logits = lax.dot_general(
        a_ref[...], c,
        dimension_numbers=(((1,), (1,)), ((), ())),
        preferred_element_type=jnp.float32,
    )
    tm = logits.shape[0]

    @pl.when(j == 0)
    def _init():
        m_ref[...] = jnp.full(m_ref.shape, _NEG, jnp.float32)
        l_ref[...] = jnp.zeros_like(l_ref)
        spl_ref[...] = jnp.zeros_like(spl_ref)
        sp_ref[...] = jnp.zeros_like(sp_ref)

    # Online LSE running max.  Padded contrast rows are all-zero features, so
    # their logits are 0; including them in the max only raises m (harmless for
    # the exact identity logZ = m + log(sum_kept exp(l - m))).
    m_prev = m_ref[...]
    m_new = jnp.maximum(m_prev, jnp.max(logits, axis=1, keepdims=True))
    alpha = jnp.exp(m_prev - m_new)
    m_ref[...] = m_new

    # Scalar predicate: does this tile touch the self-diagonal or padded columns?
    row_lo = i * tm
    col_lo = j * tn
    diag_overlap = jnp.logical_and(row_lo < col_lo + tn, col_lo < row_lo + tm)
    if has_pad:
        needs_mask = jnp.logical_or(diag_overlap, j == num_j - 1)
    else:
        needs_mask = diag_overlap

    def _update(keep):
        if keep is None:
            e = jnp.exp(logits - m_new)
        else:
            e = jnp.where(keep, jnp.exp(logits - m_new), 0.0)
        posf = pos_fn(keep)
        l_ref[...] = alpha * l_ref[...] + jnp.sum(e, axis=1, keepdims=True)
        spl_ref[...] = spl_ref[...] + jnp.sum(posf * logits, axis=1, keepdims=True)
        sp_ref[...] = sp_ref[...] + jnp.sum(posf, axis=1, keepdims=True)

    # Fast path: no self column, no padded columns in this tile -> no mask work.
    @pl.when(jnp.logical_not(needs_mask))
    def _fast():
        _update(None)

    # Masked path: build the keep mask only on the (few) tiles that need it.
    @pl.when(needs_mask)
    def _masked():
        row_g = row_lo + lax.broadcasted_iota(jnp.int32, logits.shape, 0)
        col_g = col_lo + lax.broadcasted_iota(jnp.int32, logits.shape, 1)
        keep = row_g != col_g
        if has_pad:   # static: only emit padded-column masking if padding exists
            keep = jnp.logical_and(keep, col_g < n_valid)
        _update(keep)

    @pl.when(j == num_j - 1)
    def _finalize():
        # Sum(pos * log_prob) = Sum(pos * logits) - logZ * Sum(pos)
        log_z = m_ref[...] + jnp.log(l_ref[...])
        mean_log_prob_pos = spl_ref[...] / sp_ref[...] - log_z   # 0/0 -> NaN as in torch
        out_ref[...] = (-loss_scale) * mean_log_prob_pos


def _supcon_ids_kernel(n_valid, has_pad, resident_tn, loss_scale,
                       aid_ref, cid_ref, a_ref, c_ref, out_ref,
                       m_ref, l_ref, spl_ref, sp_ref):
    pos_eq = aid_ref[...] == cid_ref[...]            # [tm,1] == [1,tn] -> [tm,tn]

    def pos_fn(keep):
        if keep is None:
            return pos_eq.astype(jnp.float32)
        return jnp.where(jnp.logical_and(pos_eq, keep), 1.0, 0.0)

    _tile_body(n_valid, has_pad, resident_tn, loss_scale, pos_fn,
               a_ref, c_ref, out_ref, m_ref, l_ref, spl_ref, sp_ref)


def _supcon_mask_kernel(n_valid, has_pad, resident_tn, loss_scale,
                        mask_ref, a_ref, c_ref, out_ref,
                        m_ref, l_ref, spl_ref, sp_ref):
    def pos_fn(keep):
        posf = mask_ref[...].astype(jnp.float32)     # bf16 0/1 relay -> exact in f32
        if keep is None:
            return posf
        return jnp.where(keep, posf, 0.0)

    _tile_body(n_valid, has_pad, resident_tn, loss_scale, pos_fn,
               a_ref, c_ref, out_ref, m_ref, l_ref, spl_ref, sp_ref)


def supcon_loss(features, labels=None, mask=None, *,
                temperature=0.07, contrast_mode='all', base_temperature=0.07,
                block_rows=512, block_cols=1024, mxu_dtype=jnp.bfloat16,
                contrast_resident='auto'):
    """JAX/Pallas equivalent of SupConLoss.forward. Returns a scalar loss."""
    features = jnp.asarray(features)
    if features.ndim < 3:
        raise ValueError('`features` needs to be [bsz, n_views, ...], '
                         'at least 3 dimensions are required')
    if features.ndim > 3:
        features = features.reshape(features.shape[0], features.shape[1], -1)
    bsz, n_views, dim = features.shape

    if labels is not None and mask is not None:
        raise ValueError('Cannot define both `labels` and `mask`')

    contrast_count = n_views
    # torch.cat(torch.unbind(features, dim=1), dim=0) -> view-major concat
    contrast_feature = jnp.transpose(features, (1, 0, 2)).reshape(bsz * n_views, dim)

    if contrast_mode == 'one':
        anchor_feature = features[:, 0]
        anchor_count = 1
    elif contrast_mode == 'all':
        anchor_feature = contrast_feature
        anchor_count = contrast_count
    else:
        raise ValueError('Unknown mode: {}'.format(contrast_mode))

    A = bsz * anchor_count
    N = bsz * contrast_count
    D = dim

    inv_t = 1.0 / float(temperature)
    loss_scale = float(temperature) / float(base_temperature)
    in_dtype = jnp.dtype(mxu_dtype)
    feat_bytes = in_dtype.itemsize

    # ---- tile sizes (rows multiple of 16 for bf16 sublanes, cols of 128 lanes) ----
    tm = min(max(16, _round_up(int(block_rows), 16)), _round_up(A, 16))
    tn = min(max(128, _round_up(int(block_cols), 128)), _round_up(N, 128))

    cap = _vmem_capacity_bytes()
    limit_cap = max(32 << 20, cap * 3 // 4)          # ~48 MiB on v7x, ~96 MiB on v5e/v6e
    mask_streamed = mask is not None

    # Shrink tiles if the (streaming) budget would exceed the VMEM cap.
    while _vmem_budget(tm, tn, D, feat_bytes, tn, mask_streamed) > limit_cap and tn > 256:
        tn //= 2
    while _vmem_budget(tm, tn, D, feat_bytes, tn, mask_streamed) > limit_cap and tm > 128:
        tm //= 2

    a_pad = _round_up(A, tm)
    n_pad = _round_up(N, tn)
    num_i = a_pad // tm
    num_j = n_pad // tn
    has_pad = (n_pad != N)

    # ---- resident-contrast decision (eliminates num_i x contrast re-reads) ----
    budget_stream = _vmem_budget(tm, tn, D, feat_bytes, tn, mask_streamed)
    budget_res = _vmem_budget(tm, tn, D, feat_bytes, n_pad, mask_streamed)
    if contrast_resident == 'auto':
        resident = (num_i > 1) and (budget_res <= limit_cap)
    else:
        resident = bool(contrast_resident) and (budget_res <= limit_cap)
    budget_final = budget_res if resident else budget_stream
    vmem_limit = int(max(32 << 20, min(budget_final, limit_cap)))

    # Fold 1/temperature into the anchors in f32 BEFORE the (possibly bf16) cast.
    anchor_p = _pad_to((anchor_feature.astype(jnp.float32) * inv_t).astype(in_dtype),
                       (a_pad, D))
    contrast_p = _pad_to(contrast_feature.astype(in_dtype), (n_pad, D))

    anchor_spec = pl.BlockSpec((tm, D), lambda i, j: (i, 0))
    if resident:
        # Constant block index -> DMA'd once, stays VMEM-resident; kernel slices
        # tn-wide chunks per j step.
        contrast_spec = pl.BlockSpec((n_pad, D), lambda i, j: (0, 0))
        resident_tn = tn
    else:
        contrast_spec = pl.BlockSpec((tn, D), lambda i, j: (j, 0))
        resident_tn = None
    out_spec = pl.BlockSpec((tm, 1), lambda i, j: (i, 0))
    scratch = [pltpu.VMEM((tm, 1), jnp.float32) for _ in range(4)]

    mask_bytes = 0
    if mask is None:
        if labels is None:
            ids = jnp.arange(bsz, dtype=jnp.int32)        # SimCLR: identity mask
        else:
            ids = jnp.asarray(labels).reshape(-1)
            if ids.shape[0] != bsz:
                raise ValueError('Num of labels does not match num of features')
            if jnp.issubdtype(ids.dtype, jnp.floating):
                ids = ids.astype(jnp.float32)
            else:
                ids = ids.astype(jnp.int32)
        aid = _pad_to(jnp.tile(ids, anchor_count).reshape(A, 1), (a_pad, 1))
        cid = _pad_to(jnp.tile(ids, contrast_count).reshape(1, N), (1, n_pad))
        kernel = functools.partial(_supcon_ids_kernel, N, has_pad, resident_tn,
                                   loss_scale)
        in_specs = [
            pl.BlockSpec((tm, 1), lambda i, j: (i, 0)),
            pl.BlockSpec((1, tn), lambda i, j: (0, j)),
            anchor_spec,
            contrast_spec,
        ]
        inputs = (aid, cid, anchor_p, contrast_p)
    else:
        # User-supplied (possibly asymmetric) [bsz, bsz] mask, streamed tile by
        # tile as bf16 (values are exactly 0/1).
        # TODO(synk): read the [bsz, bsz] base mask with a modular index_map
        # when tm | bsz and tn | bsz instead of tiling it to [A, N].
        base_mask = jnp.asarray(mask, jnp.float32)
        full_mask = _pad_to(
            jnp.tile(base_mask, (anchor_count, contrast_count)).astype(jnp.bfloat16),
            (a_pad, n_pad))
        kernel = functools.partial(_supcon_mask_kernel, N, has_pad, resident_tn,
                                   loss_scale)
        in_specs = [
            pl.BlockSpec((tm, tn), lambda i, j: (i, j)),
            anchor_spec,
            contrast_spec,
        ]
        inputs = (full_mask, anchor_p, contrast_p)
        mask_bytes = a_pad * n_pad * 2

    contrast_hbm = n_pad * D * feat_bytes if resident else num_i * n_pad * D * feat_bytes
    cost = pl.CostEstimate(
        flops=int(2 * a_pad * n_pad * D),
        transcendentals=int(a_pad * n_pad),
        bytes_accessed=int(a_pad * D * feat_bytes + contrast_hbm + mask_bytes + a_pad * 4),
    )

    out = pl.pallas_call(
        kernel,
        out_shape=jax.ShapeDtypeStruct((a_pad, 1), jnp.float32),
        grid_spec=pltpu.PrefetchScalarGridSpec(
            num_scalar_prefetch=0,
            grid=(num_i, num_j),
            in_specs=in_specs,
            out_specs=out_spec,
            scratch_shapes=scratch,
        ),
        compiler_params=pltpu.CompilerParams(
            dimension_semantics=("parallel", "arbitrary"),
            vmem_limit_bytes=vmem_limit,
        ),
        cost_estimate=cost,
    )(*inputs)

    # loss.view(anchor_count, bsz).mean() == mean over all A anchor rows.
    return jnp.mean(out[:A, 0])


def _supcon_loss_ref(features, labels=None, mask=None, temperature=0.07,
                     contrast_mode='all', base_temperature=0.07):
    """Pure-JAX reference mirroring the PyTorch module (correctness check)."""
    bsz, n_views, dim = features.shape
    if labels is None and mask is None:
        mask = jnp.eye(bsz, dtype=jnp.float32)
    elif labels is not None:
        labels = labels.reshape(-1, 1)
        mask = (labels == labels.T).astype(jnp.float32)
    else:
        mask = jnp.asarray(mask, jnp.float32)
    contrast = jnp.transpose(features, (1, 0, 2)).reshape(bsz * n_views, dim)
    if contrast_mode == 'one':
        anchor = features[:, 0]
        anchor_count = 1
    else:
        anchor = contrast
        anchor_count = n_views
    A = bsz * anchor_count
    N = bsz * n_views
    logits = anchor @ contrast.T / temperature
    logits = logits - jnp.max(logits, axis=1, keepdims=True)
    mask = jnp.tile(mask, (anchor_count, n_views))
    logits_mask = jnp.ones((A, N), jnp.float32).at[jnp.arange(A), jnp.arange(A)].set(0.0)
    mask = mask * logits_mask
    exp_logits = jnp.exp(logits) * logits_mask
    log_prob = logits - jnp.log(exp_logits.sum(1, keepdims=True))
    mean_log_prob_pos = (mask * log_prob).sum(1) / mask.sum(1)
    loss = -(temperature / base_temperature) * mean_log_prob_pos
    return loss.reshape(anchor_count, bsz).mean()


if __name__ == "__main__":
    key = jax.random.PRNGKey(0)
    k1, k2, k3, k4 = jax.random.split(key, 4)

    # ---- small demo shapes (single tile) ----
    bsz, n_views, dim = 8, 2, 32
    features = jax.random.normal(k1, (bsz, n_views, dim), dtype=jnp.float32)
    features = features / jnp.linalg.norm(features, axis=-1, keepdims=True)
    labels = jax.random.randint(k2, (bsz,), 0, 4)
    ref = _supcon_loss_ref(features, labels=labels)

    loss_f32 = jax.block_until_ready(
        supcon_loss(features, labels=labels, mxu_dtype=jnp.float32))
    assert jnp.allclose(loss_f32, ref, rtol=1e-4, atol=1e-4), (loss_f32, ref)

    loss_bf16 = jax.block_until_ready(supcon_loss(features, labels=labels))
    assert jnp.allclose(loss_bf16, ref, rtol=5e-2, atol=5e-2), (loss_bf16, ref)

    loss_simclr = jax.block_until_ready(supcon_loss(features, mxu_dtype=jnp.float32))
    ref_simclr = _supcon_loss_ref(features)
    assert jnp.allclose(loss_simclr, ref_simclr, rtol=1e-4, atol=1e-4)

    user_mask = (labels.reshape(-1, 1) == labels.reshape(1, -1)).astype(jnp.float32)
    loss_mask = jax.block_until_ready(
        supcon_loss(features, mask=user_mask, mxu_dtype=jnp.float32))
    assert jnp.allclose(loss_mask, ref, rtol=1e-4, atol=1e-4), (loss_mask, ref)

    loss_one = jax.block_until_ready(
        supcon_loss(features, labels=labels, contrast_mode='one',
                    mxu_dtype=jnp.float32))
    ref_one = _supcon_loss_ref(features, labels=labels, contrast_mode='one')
    assert jnp.allclose(loss_one, ref_one, rtol=1e-4, atol=1e-4), (loss_one, ref_one)

    # ---- multi-tile shapes: exercise diagonal/padding gating, streaming and
    #      VMEM-resident contrast paths, multiple i and j grid steps ----
    bsz2, dim2 = 75, 64
    feat2 = jax.random.normal(k3, (bsz2, 2, dim2), dtype=jnp.float32)
    feat2 = feat2 / jnp.linalg.norm(feat2, axis=-1, keepdims=True)
    labels2 = jax.random.randint(k4, (bsz2,), 0, 6)
    ref2 = _supcon_loss_ref(feat2, labels=labels2)

    loss2_default = jax.block_until_ready(
        supcon_loss(feat2, labels=labels2, mxu_dtype=jnp.float32))
    assert jnp.allclose(loss2_default, ref2, rtol=1e-4, atol=1e-4), (loss2_default, ref2)

    for res in (False, True):
        got = jax.block_until_ready(
            supcon_loss(feat2, labels=labels2, mxu_dtype=jnp.float32,
                        block_rows=64, block_cols=128, contrast_resident=res))
        assert jnp.allclose(got, ref2, rtol=1e-4, atol=1e-4), (res, got, ref2)

    user_mask2 = (labels2.reshape(-1, 1) == labels2.reshape(1, -1)).astype(jnp.float32)
    loss2_mask = jax.block_until_ready(
        supcon_loss(feat2, mask=user_mask2, mxu_dtype=jnp.float32,
                    block_rows=64, block_cols=128, contrast_resident=True))
    assert jnp.allclose(loss2_mask, ref2, rtol=1e-4, atol=1e-4), (loss2_mask, ref2)

    loss2_bf16 = jax.block_until_ready(supcon_loss(feat2, labels=labels2))
    assert jnp.allclose(loss2_bf16, ref2, rtol=5e-2, atol=5e-2), (loss2_bf16, ref2)

    print("KERNEL_OK")
</pallas_src>

<mosaic_0001>
module attributes {stable_mosaic.version = 11 : i64} {
  func.func @_supcon_ids_kernel(%arg0: i32, %arg1: i32, %arg2: memref<16x1xi32, #tpu.memory_space<vmem>>, %arg3: memref<1x128xi32, #tpu.memory_space<vmem>>, %arg4: memref<16x32xf32, #tpu.memory_space<vmem>>, %arg5: memref<128x32xf32, #tpu.memory_space<vmem>>, %arg6: memref<16x1xf32, #tpu.memory_space<vmem>>, %arg7: memref<16x1xf32, #tpu.memory_space<vmem>>, %arg8: memref<16x1xf32, #tpu.memory_space<vmem>>, %arg9: memref<16x1xf32, #tpu.memory_space<vmem>>, %arg10: memref<16x1xf32, #tpu.memory_space<vmem>>) attributes {dimension_semantics = [#tpu.dimension_semantics<parallel>, #tpu.dimension_semantics<arbitrary>], iteration_bounds = array<i64: 1, 1>, scalar_prefetch = 0 : i64, scratch_operands = 4 : i64, tpu.core_type = #tpu.core_type<tc>, window_params = [{transform_indices = @transform_0, window_bounds = array<i64: 16, 1>}, {transform_indices = @transform_1, window_bounds = array<i64: 1, 128>}, {transform_indices = @transform_2, window_bounds = array<i64: 16, 32>}, {transform_indices = @transform_3, window_bounds = array<i64: 128, 32>}, {transform_indices = @transform_4, window_bounds = array<i64: 16, 1>}]} {
    %c0 = arith.constant 0 : index
    %c0_0 = arith.constant 0 : index
    %0 = vector.load %arg2[%c0, %c0_0] : memref<16x1xi32, #tpu.memory_space<vmem>>, vector<16x1xi32>
    %c0_1 = arith.constant 0 : index
    %c0_2 = arith.constant 0 : index
    %1 = vector.load %arg3[%c0_1, %c0_2] : memref<1x128xi32, #tpu.memory_space<vmem>>, vector<1x128xi32>
    %2 = vector.broadcast %0 : vector<16x1xi32> to vector<16x128xi32>
    %3 = vector.broadcast %1 : vector<1x128xi32> to vector<16x128xi32>
    %4 = arith.cmpi eq, %2, %3 : vector<16x128xi32>
    %c0_3 = arith.constant 0 : index
    %c0_4 = arith.constant 0 : index
    %5 = vector.load %arg5[%c0_3, %c0_4] : memref<128x32xf32, #tpu.memory_space<vmem>>, vector<128x32xf32>
    %c0_5 = arith.constant 0 : index
    %c0_6 = arith.constant 0 : index
    %6 = vector.load %arg4[%c0_5, %c0_6] : memref<16x32xf32, #tpu.memory_space<vmem>>, vector<16x32xf32>
    %cst = arith.constant dense<0.000000e+00> : vector<16x128xf32>
    %7 = tpu.matmul %6, %5, %cst {dimension_numbers = #tpu.dot_dimension_numbers<[1], [1], [0], [0], [0, 0, 1, 0], [], []>} : vector<16x32xf32>, vector<128x32xf32>, vector<16x128xf32> -> vector<16x128xf32>
    %c0_i32 = arith.constant 0 : i32
    %8 = arith.cmpi eq, %arg1, %c0_i32 : i32
    %9 = arith.extui %8 : i1 to i32
    %c0_i32_7 = arith.constant 0 : i32
    %10 = arith.cmpi ne, %9, %c0_i32_7 : i32
    scf.if %10 {
      %cst_20 = arith.constant -1.000000e+30 : f32
      %35 = vector.broadcast %cst_20 : f32 to vector<16x1xf32>
      %c0_21 = arith.constant 0 : index
      %c0_22 = arith.constant 0 : index
      %36 = vector.load %arg7[%c0_21, %c0_22] : memref<16x1xf32, #tpu.memory_space<vmem>>, vector<16x1xf32>
      tpu.vector_store %arg7[%c0_21, %c0_22], %35 {strides = array<i32>} : memref<16x1xf32, #tpu.memory_space<vmem>>, vector<16x1xf32>,
      %cst_23 = arith.constant 0.000000e+00 : f32
      %37 = vector.broadcast %cst_23 : f32 to vector<16x1xf32>
      %c0_24 = arith.constant 0 : index
      %c0_25 = arith.constant 0 : index
      %38 = vector.load %arg8[%c0_24, %c0_25] : memref<16x1xf32, #tpu.memory_space<vmem>>, vector<16x1xf32>
      tpu.vector_store %arg8[%c0_24, %c0_25], %37 {strides = array<i32>} : memref<16x1xf32, #tpu.memory_space<vmem>>, vector<16x1xf32>,
      %cst_26 = arith.constant 0.000000e+00 : f32
      %39 = vector.broadcast %cst_26 : f32 to vector<16x1xf32>
      %c0_27 = arith.constant 0 : index
      %c0_28 = arith.constant 0 : index
      %40 = vector.load %arg9[%c0_27, %c0_28] : memref<16x1xf32, #tpu.memory_space<vmem>>, vector<16x1xf32>
      tpu.vector_store %arg9[%c0_27, %c0_28], %39 {strides = array<i32>} : memref<16x1xf32, #tpu.memory_space<vmem>>, vector<16x1xf32>,
      %cst_29 = arith.constant 0.000000e+00 : f32
      %41 = vector.broadcast %cst_29 : f32 to vector<16x1xf32>
      %c0_30 = arith.constant 0 : index
      %c0_31 = arith.constant 0 : index
      %42 = vector.load %arg10[%c0_30, %c0_31] : memref<16x1xf32, #tpu.memory_space<vmem>>, vector<16x1xf32>
      tpu.vector_store %arg10[%c0_30, %c0_31], %41 {strides = array<i32>} : memref<16x1xf32, #tpu.memory_space<vmem>>, vector<16x1xf32>,
    } else {
    }
    %c0_8 = arith.constant 0 : index
    %c0_9 = arith.constant 0 : index
    %11 = vector.load %arg7[%c0_8, %c0_9] : memref<16x1xf32, #tpu.memory_space<vmem>>, vector<16x1xf32>
    %cst_10 = arith.constant dense<0xFF800000> : vector<16xf32>
    %12 = vector.multi_reduction <maximumf>, %7, %cst_10 [1] : vector<16x128xf32> to vector<16xf32>
    %13 = vector.shape_cast %12 : vector<16xf32> to vector<16x1xf32>
    %14 = arith.maximumf %11, %13 : vector<16x1xf32>
    %15 = arith.subf %11, %14 : vector<16x1xf32>
    %16 = math.exp %15 : vector<16x1xf32>
    %c0_11 = arith.constant 0 : index
    %c0_12 = arith.constant 0 : index
    %17 = vector.load %arg7[%c0_11, %c0_12] : memref<16x1xf32, #tpu.memory_space<vmem>>, vector<16x1xf32>
    tpu.vector_store %arg7[%c0_11, %c0_12], %14 {strides = array<i32>} : memref<16x1xf32, #tpu.memory_space<vmem>>, vector<16x1xf32>,
    %c16_i32 = arith.constant 16 : i32
    %18 = arith.muli %arg0, %c16_i32 : i32
    %c128_i32 = arith.constant 128 : i32
    %19 = arith.muli %arg1, %c128_i32 : i32
    %c128_i32_13 = arith.constant 128 : i32
    %20 = arith.addi %19, %c128_i32_13 : i32
    %21 = arith.cmpi slt, %18, %20 : i32
    %c16_i32_14 = arith.constant 16 : i32
    %22 = arith.addi %18, %c16_i32_14 : i32
    %23 = arith.cmpi slt, %19, %22 : i32
    %24 = arith.andi %21, %23 : i1
    %c0_i32_15 = arith.constant 0 : i32
    %25 = arith.cmpi eq, %arg1, %c0_i32_15 : i32
    %26 = arith.ori %24, %25 : i1
    %true = arith.constant true
    %27 = arith.xori %26, %true : i1
    %28 = arith.extui %27 : i1 to i32
    %c0_i32_16 = arith.constant 0 : i32
    %29 = arith.cmpi ne, %28, %c0_i32_16 : i32
    scf.if %29 {
      %35 = vector.broadcast %14 : vector<16x1xf32> to vector<16x128xf32>
      %36 = arith.subf %7, %35 : vector<16x128xf32>
      %37 = math.exp %36 : vector<16x128xf32>
      %38 = arith.extui %4 : vector<16x128xi1> to vector<16x128xi32>
      %39 = arith.sitofp %38 : vector<16x128xi32> to vector<16x128xf32>
      %c0_20 = arith.constant 0 : index
      %c0_21 = arith.constant 0 : index
      %40 = vector.load %arg8[%c0_20, %c0_21] : memref<16x1xf32, #tpu.memory_space<vmem>>, vector<16x1xf32>
      %41 = arith.mulf %16, %40 : vector<16x1xf32>
      %cst_22 = arith.constant dense<0.000000e+00> : vector<16xf32>
      %42 = vector.multi_reduction <add>, %37, %cst_22 [1] : vector<16x128xf32> to vector<16xf32>
      %43 = vector.shape_cast %42 : vector<16xf32> to vector<16x1xf32>
      %44 = arith.addf %41, %43 : vector<16x1xf32>
      %c0_23 = arith.constant 0 : index
      %c0_24 = arith.constant 0 : index
      %45 = vector.load %arg8[%c0_23, %c0_24] : memref<16x1xf32, #tpu.memory_space<vmem>>, vector<16x1xf32>
      tpu.vector_store %arg8[%c0_23, %c0_24], %44 {strides = array<i32>} : memref<16x1xf32, #tpu.memory_space<vmem>>, vector<16x1xf32>,
      %c0_25 = arith.constant 0 : index
      %c0_26 = arith.constant 0 : index
      %46 = vector.load %arg9[%c0_25, %c0_26] : memref<16x1xf32, #tpu.memory_space<vmem>>, vector<16x1xf32>
      %47 = arith.mulf %39, %7 : vector<16x128xf32>
      %cst_27 = arith.constant dense<0.000000e+00> : vector<16xf32>
      %48 = vector.multi_reduction <add>, %47, %cst_27 [1] : vector<16x128xf32> to vector<16xf32>
      %49 = vector.shape_cast %48 : vector<16xf32> to vector<16x1xf32>
      %50 = arith.addf %46, %49 : vector<16x1xf32>
      %c0_28 = arith.constant 0 : index
      %c0_29 = arith.constant 0 : index
      %51 = vector.load %arg9[%c0_28, %c0_29] : memref<16x1xf32, #tpu.memory_space<vmem>>, vector<16x1xf32>
      tpu.vector_store %arg9[%c0_28, %c0_29], %50 {strides = array<i32>} : memref<16x1xf32, #tpu.memory_space<vmem>>, vector<16x1xf32>,
      %c0_30 = arith.constant 0 : index
      %c0_31 = arith.constant 0 : index
      %52 = vector.load %arg10[%c0_30, %c0_31] : memref<16x1xf32, #tpu.memory_space<vmem>>, vector<16x1xf32>
      %cst_32 = arith.constant dense<0.000000e+00> : vector<16xf32>
      %53 = vector.multi_reduction <add>, %39, %cst_32 [1] : vector<16x128xf32> to vector<16xf32>
      %54 = vector.shape_cast %53 : vector<16xf32> to vector<16x1xf32>
      %55 = arith.addf %52, %54 : vector<16x1xf32>
      %c0_33 = arith.constant 0 : index
      %c0_34 = arith.constant 0 : index
      %56 = vector.load %arg10[%c0_33, %c0_34] : memref<16x1xf32, #tpu.memory_space<vmem>>, vector<16x1xf32>
      tpu.vector_store %arg10[%c0_33, %c0_34], %55 {strides = array<i32>} : memref<16x1xf32, #tpu.memory_space<vmem>>, vector<16x1xf32>,
    } else {
    }
    %30 = arith.extui %26 : i1 to i32
    %c0_i32_17 = arith.constant 0 : i32
    %31 = arith.cmpi ne, %30, %c0_i32_17 : i32
    scf.if %31 {
      %35 = tpu.iota {dimensions = array<i32: 0>} : vector<16x128xi32>
      %36 = vector.broadcast %18 : i32 to vector<16x128xi32>
      %37 = arith.addi %36, %35 : vector<16x128xi32>
      %38 = tpu.iota {dimensions = array<i32: 1>} : vector<16x128xi32>
      %39 = vector.broadcast %19 : i32 to vector<16x128xi32>
      %40 = arith.addi %39, %38 : vector<16x128xi32>
      %41 = arith.cmpi ne, %37, %40 : vector<16x128xi32>
      %c16_i32_20 = arith.constant 16 : i32
      %42 = vector.broadcast %c16_i32_20 : i32 to vector<16x128xi32>
      %43 = arith.cmpi slt, %40, %42 : vector<16x128xi32>
      %44 = arith.andi %41, %43 : vector<16x128xi1>
      %45 = vector.broadcast %14 : vector<16x1xf32> to vector<16x128xf32>
      %46 = arith.subf %7, %45 : vector<16x128xf32>
      %47 = math.exp %46 : vector<16x128xf32>
      %cst_21 = arith.constant 0.000000e+00 : f32
      %48 = vector.broadcast %cst_21 : f32 to vector<16x128xf32>
      %49 = arith.select %44, %47, %48 : vector<16x128xi1>, vector<16x128xf32>
      %50 = arith.andi %4, %44 : vector<16x128xi1>
      %cst_22 = arith.constant 1.000000e+00 : f32
      %cst_23 = arith.constant 0.000000e+00 : f32
      %51 = vector.broadcast %cst_22 : f32 to vector<16x128xf32>
      %52 = vector.broadcast %cst_23 : f32 to vector<16x128xf32>
      %53 = arith.select %50, %51, %52 : vector<16x128xi1>, vector<16x128xf32>
      %c0_24 = arith.constant 0 : index
      %c0_25 = arith.constant 0 : index
      %54 = vector.load %arg8[%c0_24, %c0_25] : memref<16x1xf32, #tpu.memory_space<vmem>>, vector<16x1xf32>
      %55 = arith.mulf %16, %54 : vector<16x1xf32>
      %cst_26 = arith.constant dense<0.000000e+00> : vector<16xf32>
      %56 = vector.multi_reduction <add>, %49, %cst_26 [1] : vector<16x128xf32> to vector<16xf32>
      %57 = vector.shape_cast %56 : vector<16xf32> to vector<16x1xf32>
      %58 = arith.addf %55, %57 : vector<16x1xf32>
      %c0_27 = arith.constant 0 : index
      %c0_28 = arith.constant 0 : index
      %59 = vector.load %arg8[%c0_27, %c0_28] : memref<16x1xf32, #tpu.memory_space<vmem>>, vector<16x1xf32>
      tpu.vector_store %arg8[%c0_27, %c0_28], %58 {strides = array<i32>} : memref<16x1xf32, #tpu.memory_space<vmem>>, vector<16x1xf32>,
      %c0_29 = arith.constant 0 : index
      %c0_30 = arith.constant 0 : index
      %60 = vector.load %arg9[%c0_29, %c0_30] : memref<16x1xf32, #tpu.memory_space<vmem>>, vector<16x1xf32>
      %61 = arith.mulf %53, %7 : vector<16x128xf32>
      %cst_31 = arith.constant dense<0.000000e+00> : vector<16xf32>
      %62 = vector.multi_reduction <add>, %61, %cst_31 [1] : vector<16x128xf32> to vector<16xf32>
      %63 = vector.shape_cast %62 : vector<16xf32> to vector<16x1xf32>
      %64 = arith.addf %60, %63 : vector<16x1xf32>
      %c0_32 = arith.constant 0 : index
      %c0_33 = arith.constant 0 : index
      %65 = vector.load %arg9[%c0_32, %c0_33] : memref<16x1xf32, #tpu.memory_space<vmem>>, vector<16x1xf32>
      tpu.vector_store %arg9[%c0_32, %c0_33], %64 {strides = array<i32>} : memref<16x1xf32, #tpu.memory_space<vmem>>, vector<16x1xf32>,
      %c0_34 = arith.constant 0 : index
      %c0_35 = arith.constant 0 : index
      %66 = vector.load %arg10[%c0_34, %c0_35] : memref<16x1xf32, #tpu.memory_space<vmem>>, vector<16x1xf32>
      %cst_36 = arith.constant dense<0.000000e+00> : vector<16xf32>
      %67 = vector.multi_reduction <add>, %53, %cst_36 [1] : vector<16x128xf32> to vector<16xf32>
      %68 = vector.shape_cast %67 : vector<16xf32> to vector<16x1xf32>
      %69 = arith.addf %66, %68 : vector<16x1xf32>
      %c0_37 = arith.constant 0 : index
      %c0_38 = arith.constant 0 : index
      %70 = vector.load %arg10[%c0_37, %c0_38] : memref<16x1xf32, #tpu.memory_space<vmem>>, vector<16x1xf32>
      tpu.vector_store %arg10[%c0_37, %c0_38], %69 {strides = array<i32>} : memref<16x1xf32, #tpu.memory_space<vmem>>, vector<16x1xf32>,
    } else {
    }
    %c0_i32_18 = arith.constant 0 : i32
    %32 = arith.cmpi eq, %arg1, %c0_i32_18 : i32
    %33 = arith.extui %32 : i1 to i32
    %c0_i32_19 = arith.constant 0 : i32
    %34 = arith.cmpi ne, %33, %c0_i32_19 : i32
    scf.if %34 {
      %c0_20 = arith.constant 0 : index
      %c0_21 = arith.constant 0 : index
      %35 = vector.load %arg7[%c0_20, %c0_21] : memref<16x1xf32, #tpu.memory_space<vmem>>, vector<16x1xf32>
      %c0_22 = arith.constant 0 : index
      %c0_23 = arith.constant 0 : index
      %36 = vector.load %arg8[%c0_22, %c0_23] : memref<16x1xf32, #tpu.memory_space<vmem>>, vector<16x1xf32>
      %37 = math.log %36 : vector<16x1xf32>
      %38 = arith.addf %35, %37 : vector<16x1xf32>
      %c0_24 = arith.constant 0 : index
      %c0_25 = arith.constant 0 : index
      %39 = vector.load %arg9[%c0_24, %c0_25] : memref<16x1xf32, #tpu.memory_space<vmem>>, vector<16x1xf32>
      %c0_26 = arith.constant 0 : index
      %c0_27 = arith.constant 0 : index
      %40 = vector.load %arg10[%c0_26, %c0_27] : memref<16x1xf32, #tpu.memory_space<vmem>>, vector<16x1xf32>
      %41 = arith.divf %39, %40 : vector<16x1xf32>
      %42 = arith.subf %41, %38 : vector<16x1xf32>
      %cst_28 = arith.constant -1.000000e+00 : f32
      %43 = vector.broadcast %cst_28 : f32 to vector<16x1xf32>
      %44 = arith.mulf %43, %42 : vector<16x1xf32>
      %c0_29 = arith.constant 0 : index
      %c0_30 = arith.constant 0 : index
      %45 = vector.load %arg6[%c0_29, %c0_30] : memref<16x1xf32, #tpu.memory_space<vmem>>, vector<16x1xf32>
      tpu.vector_store %arg6[%c0_29, %c0_30], %44 {strides = array<i32>} : memref<16x1xf32, #tpu.memory_space<vmem>>, vector<16x1xf32>,
    } else {
    }
    return
  }
  func.func @transform_0(%arg0: i32, %arg1: i32) -> (i32, i32) {
    %c0_i32 = arith.constant 0 : i32
    %c0_i32_0 = arith.constant 0 : i32
    return %arg0, %c0_i32 : i32, i32
  }
  func.func @transform_1(%arg0: i32, %arg1: i32) -> (i32, i32) {
    %c0_i32 = arith.constant 0 : i32
    %c0_i32_0 = arith.constant 0 : i32
    return %c0_i32, %arg1 : i32, i32
  }
  func.func @transform_2(%arg0: i32, %arg1: i32) -> (i32, i32) {
    %c0_i32 = arith.constant 0 : i32
    %c0_i32_0 = arith.constant 0 : i32
    return %arg0, %c0_i32 : i32, i32
  }
  func.func @transform_3(%arg0: i32, %arg1: i32) -> (i32, i32) {
    %c0_i32 = arith.constant 0 : i32
    %c0_i32_0 = arith.constant 0 : i32
    return %arg1, %c0_i32 : i32, i32
  }
  func.func @transform_4(%arg0: i32, %arg1: i32) -> (i32, i32) {
    %c0_i32 = arith.constant 0 : i32
    %c0_i32_0 = arith.constant 0 : i32
    return %arg0, %c0_i32 : i32, i32
  }
}

</mosaic_0001>

<bundles_post_ra>
// kernel: tpu_custom_call.1
= control target key start
LH: loop header
LB: loop body
LE: loop exit
PB: predicated region body
PF: predicated region fallthrough
CT: control target
= control target key end

     0   :  { %vm47_vm0 = vcmask 261120   ;;  %v411_v11 = vmov 0   ;;  %v167_v22 = vlaneseq  ;;  %v412_v29 = vmov 0.0   ;;  %s578_s3 = inlined_call_operand.vmem [shape: f32[128,32], index: 3, kind: input, shape index: {}]   ;;  %s579_s1 = inlined_call_operand.vmem [shape: s32[1,128], index: 1, kind: input, shape index: {}]   ;;  %s580_s0 = inlined_call_operand.vmem [shape: s32[16,1], index: 0, kind: input, shape index: {}]   ;;  %s581_s2 = inlined_call_operand.vmem [shape: f32[16,32], index: 2, kind: input, shape index: {}]   ;;  %s582_s4 = inlined_call_operand.vmem [shape: f32[16,1], index: 4, kind: output, shape index: {}]  }
   0x1   :  { %v44_v0 = vld [vmem:[%s578_s3 + $0x78] sm:$0xff]  ;;  %v43_v1 = vld [vmem:[%s578_s3 + $0x70] sm:$0xff]  ;;  %v42_v2 = vld [vmem:[%s578_s3 + $0x68] sm:$0xff]  ;;  %392 = vset.pattern.permute.xlu2 %v411_v11  ;;  %391 = vset.pattern.permute.xlu1 %v411_v11  ;;  %vm129_vm6 = vcmask 7168   ;;  %v413_v31 = vmov -1e+30  }
   0x2   :  { %352 = vmatpush.xpose.msk.msra.mxu0 %vm47_vm0, %v44_v0  ;;  %372 = vmatpush.xpose.msk.msra.mxu1 %vm47_vm0, %v44_v0  ;;  %v41_v3 = vld [vmem:[%s578_s3 + $0x60] sm:$0xff]  ;;  %v40_v4 = vld [vmem:[%s578_s3 + $0x58] sm:$0xff]  ;;  %v39_v5 = vld [vmem:[%s578_s3 + $0x50] sm:$0xff]  ;;  %v168_v24 = vshrl.u32 %v167_v22, 7  ;;  %v174_v25 = vand.u32 127, %v167_v22  ;;  %130 = vst.msk [vmem:[#allocation2] sm:$0xff] %vm129_vm6, %v413_v31 }
   0x3   :  { %v38_v6 = vld [vmem:[%s578_s3 + $0x48] sm:$0xff]  ;;  %v37_v7 = vld [vmem:[%s578_s3 + $0x40] sm:$0xff]  ;;  %v36_v8 = vld [vmem:[%s578_s3 + $0x38] sm:$0xff]  ;;  %393 = vset.pattern.permute.xlu0 %v411_v11  ;;  %131 = vst.msk [vmem:[#allocation2 + $0x8] sm:$0xff] %vm129_vm6, %v413_v31 }
   0x4   :  { %v17_v9 = vld [vmem:[%s580_s0] sm:$0xff]  ;;  %v35_v10 = vld [vmem:[%s578_s3 + $0x30] sm:$0xff]  ;;  %v34_v12 = vld [vmem:[%s578_s3 + $0x28] sm:$0xff]  ;;  %v169_v27 = vadd.s32 8, %v168_v24  ;;  %vm179_vm2 = vcmp.lt.s32.totalorder %v174_v25, 16  ;;  %132 = vst.msk [vmem:[#allocation3] sm:$0xff] %vm129_vm6, %v412_v29  ;;  %vm177_vm7 = vcmp.ne.s32.totalorder %v168_v24, %v174_v25 }
   0x5   :  { %21 = vperm.xlu2 %392, %v17_v9   ;;  %v18_v13 = vld [vmem:[%s580_s0 + $0x8] sm:$0xff]  ;;  %v33_v14 = vld [vmem:[%s578_s3 + $0x20] sm:$0xff]  ;;  %v32_v15 = vld [vmem:[%s578_s3 + $0x18] sm:$0xff]  ;;  %133 = vst.msk [vmem:[#allocation3 + $0x8] sm:$0xff] %vm129_vm6, %v412_v29 }
   0x6   :  { %353 = vmatpush.xpose.msk.msra.mxu0 %vm47_vm0, %v43_v1  ;;  %373 = vmatpush.xpose.msk.msra.mxu1 %vm47_vm0, %v43_v1  ;;  %v31_v16 = vld [vmem:[%s578_s3 + $0x10] sm:$0xff]  ;;  %v30_v17 = vld [vmem:[%s578_s3 + $0x8] sm:$0xff]  ;;  %v29_v18 = vld [vmem:[%s578_s3] sm:$0xff]  ;;  %vm178_vm3 = vcmp.ne.s32.totalorder %v169_v27, %v174_v25  ;;  %134 = vst.msk [vmem:[#allocation4] sm:$0xff] %vm129_vm6, %v412_v29 }
   0x7   :  { %v45_v19 = vld [vmem:[%s581_s2] sm:$0xff]  ;;  %v46_v20 = vld [vmem:[%s581_s2 + $0x8] sm:$0xff]  ;;  %vm537_vm4 = vmand %vm178_vm3, %vm179_vm2  ;;  %135 = vst.msk [vmem:[#allocation4 + $0x8] sm:$0xff] %vm129_vm6, %v412_v29 }
   0x8   :  { %v394_v26 = vld [vmem:[%s579_s1] ss:$0 sm:$0xff]  ;;  %136 = vst.msk [vmem:[#allocation5] sm:$0xff] %vm129_vm6, %v412_v29  ;;  %vm552_vm9 = vmand %vm177_vm7, %vm179_vm2 }
   0x9   :  { %137 = vst.msk [vmem:[#allocation5 + $0x8] sm:$0xff] %vm129_vm6, %v412_v29  ;;  %v138_v36 = vld [vmem:[#allocation2] sm:$0xff] }
   0xa   :  { %354 = vmatpush.xpose.msk.msra.mxu0 %vm47_vm0, %v42_v2  ;;  %374 = vmatpush.xpose.msk.msra.mxu1 %vm47_vm0, %v42_v2  ;;  %v139_v40 = vld [vmem:[#allocation2 + $0x8] sm:$0xff] }
   0xb   :  { %v204_v2 = vld [vmem:[#allocation3] sm:$0xff] }
   0xc   :  { %v205_v9 = vld [vmem:[#allocation3 + $0x8] sm:$0xff] }
   0xd   :  { %24 = vperm.xlu2 %392, %v18_v13  }
   0xe   :  { %355 = vmatpush.xpose.msk.msra.mxu0 %vm47_vm0, %v41_v3  ;;  %375 = vmatpush.xpose.msk.msra.mxu1 %vm47_vm0, %v41_v3 }
   0xf   :  { %v228_v47 = vld [vmem:[#allocation5] sm:$0xff] }
  0x10   :  { %v229_v59 = vld [vmem:[#allocation5 + $0x8] sm:$0xff] }
  0x12   :  { %356 = vmatpush.xpose.msk.msra.mxu0 %vm47_vm0, %v40_v4  ;;  %376 = vmatpush.xpose.msk.msra.mxu1 %vm47_vm0, %v40_v4 }
  0x16   :  { %357 = vmatpush.xpose.msk.msra.mxu0 %vm47_vm0, %v39_v5  ;;  %377 = vmatpush.xpose.msk.msra.mxu1 %vm47_vm0, %v39_v5 }
  0x1a   :  { %358 = vmatpush.xpose.msk.msra.mxu0 %vm47_vm0, %v38_v6  ;;  %378 = vmatpush.xpose.msk.msra.mxu1 %vm47_vm0, %v38_v6 }
  0x1e   :  { %359 = vmatpush.xpose.msk.msra.mxu0 %vm47_vm0, %v37_v7  ;;  %379 = vmatpush.xpose.msk.msra.mxu1 %vm47_vm0, %v37_v7 }
  0x22   :  { %360 = vmatpush.xpose.msk.msra.mxu0 %vm47_vm0, %v36_v8  ;;  %380 = vmatpush.xpose.msk.msra.mxu1 %vm47_vm0, %v36_v8 }
  0x26   :  { %361 = vmatpush.xpose.msk.msra.mxu0 %vm47_vm0, %v35_v10  ;;  %381 = vmatpush.xpose.msk.msra.mxu1 %vm47_vm0, %v35_v10 }
  0x2a   :  { %362 = vmatpush.xpose.msk.msra.mxu0 %vm47_vm0, %v34_v12  ;;  %382 = vmatpush.xpose.msk.msra.mxu1 %vm47_vm0, %v34_v12 }
  0x2e   :  { %363 = vmatpush.xpose.msk.msra.mxu0 %vm47_vm0, %v33_v14  ;;  %383 = vmatpush.xpose.msk.msra.mxu1 %vm47_vm0, %v33_v14 }
  0x32   :  { %364 = vmatpush.xpose.msk.msra.mxu0 %vm47_vm0, %v32_v15  ;;  %384 = vmatpush.xpose.msk.msra.mxu1 %vm47_vm0, %v32_v15 }
  0x36   :  { %365 = vmatpush.xpose.msk.msra.mxu0 %vm47_vm0, %v31_v16  ;;  %385 = vmatpush.xpose.msk.msra.mxu1 %vm47_vm0, %v31_v16 }
  0x3a   :  { %366 = vmatpush.xpose.msk.msra.mxu0 %vm47_vm0, %v30_v17  ;;  %386 = vmatpush.xpose.msk.msra.mxu1 %vm47_vm0, %v30_v17  ;;  %v216_v17 = vld [vmem:[#allocation4] sm:$0xff] }
  0x3e   :  { %367 = vmatpush.xpose.msk.msra.mxu0 %vm47_vm0, %v29_v18  ;;  %387 = vmatpush.xpose.msk.msra.mxu1 %vm47_vm0, %v29_v18 }
  0x41   :  { %368 = vmatmul.msk.f32.vlgmr.msra.gmra.mxu0 %vm47_vm0, %v45_v19  ;;  %369 = vmatmul.msk.f32.vlgmr.msra.gmra.mxu1 %vm47_vm0, %v46_v20 }
  0x5f   :  { %v22_v21 = vpop.permute.xlu2 %21 }
  0x60   :  { %vm27_vm8 = vcmp.eq.s32.totalorder %v22_v21, %v394_v26 }
  0x61   :  { %vm200_vm10 = vmand %vm27_vm8, %vm552_vm9 }
  0x62   :  { %v202_v35 = vsel %vm200_vm10, 1.0, %v412_v29 }
  0x67   :  { %v25_v23 = vpop.permute.xlu2 %24 }
  0x68   :  { %vm28_vm1 = vcmp.eq.s32.totalorder %v25_v23, %v394_v26 }
  0x69   :  { %vm201_vm5 = vmand %vm28_vm1, %vm537_vm4 }
  0x6a   :  { %v203_v30 = vsel %vm201_vm5, 1.0, %v412_v29  ;;  %v217_v29 = vld [vmem:[#allocation4 + $0x8] sm:$0xff] }
  0xbe   :  { %v119_v32 = vpop.f32.mrf.mxu0  ;;  %v122_v33 = vpop.f32.mrf.mxu1 }
  0xbf   :  { %140 = vmax.xlane.f32.xlu0 %v119_v32  ;;  %v218_v57 = vmul.f32 %v202_v35, %v119_v32  ;;  %v219_v58 = vmul.f32 %v203_v30, %v122_v33 }
  0xc7   :  { %142 = vmax.xlane.f32.xlu0 %v122_v33 }
  0xcf   :  { %230 = vadd.xlane.f32.xlu0 %v202_v35 }
 0x132   :  { %v141_v37 = vpop.xlane.xlu0 %140 }
 0x133   :  { %v144_v38 = vmax.f32 %v138_v36, %v141_v37 }
 0x135   :  { %v146_v39 = vsub.f32 %v138_v36, %v144_v38  ;;  %153 = vst.msk [vmem:[#allocation2] sm:$0xff] %vm129_vm6, %v144_v38  ;;  %184 = vperm.xlu1 %391, %v144_v38  }
 0x137   :  { %v148_v62 = vmul.f32 1.442695, %v146_v39 }
 0x13a   :  { %v143_v41 = vpop.xlane.xlu0 %142 }
 0x13b   :  { %v145_v42 = vmax.f32 %v139_v40, %v143_v41 }
 0x13c   :  { %v298_v35 = vld [vmem:[#allocation2] sm:$0xff] }
 0x13d   :  { %v147_v43 = vsub.f32 %v139_v40, %v145_v42  ;;  %154 = vst.msk [vmem:[#allocation2 + $0x8] sm:$0xff] %vm129_vm6, %v145_v42  ;;  %189 = vperm.xlu1 %391, %v145_v42  }
 0x13f   :  { %v150_v63 = vmul.f32 1.442695, %v147_v43 }
 0x142   :  { %v231_v48 = vpop.xlane.xlu0 %230 }
 0x143   :  { %v234_v49 = vadd.f32 %v231_v48, %v228_v47 }
 0x145   :  { %236 = vst.msk [vmem:[#allocation5] sm:$0xff] %vm129_vm6, %v234_v49  ;;  %v299_v49 = vld [vmem:[#allocation2 + $0x8] sm:$0xff] }
 0x14c   :  { %v310_v0 = vld [vmem:[#allocation5] sm:$0xff] }
 0x14d   :  { %vm317_vm11 = vweird.f32 %v310_v0  ;;  %v323_v22 = vand.u32 2147483648, %v310_v0  ;;  %v321_v26 = vand.u32 2147483647, %v310_v0 }
 0x14f   :  { %v324_v28 = vor.u32 1.1754944e-38, %v323_v22  ;;  %vm322_vm14 = vcmp.eq.f32.partialorder %v321_v26, 8.507059e+37 }
 0x167   :  { %232 = vadd.xlane.f32.xlu1 %v203_v30 }
 0x1a7   :  { %v185_v44 = vpop.permute.xlu1 %184 }
 0x1a8   :  { %v192_v45 = vsub.f32 %v119_v32, %v185_v44 }
 0x1aa   :  { %v194_v46 = vmul.f32 1.442695, %v192_v45 }
 0x1ac   :  { %395 = vpow2.f32 %v194_v46 }
 0x1af   :  { %v190_v50 = vpop.permute.xlu1 %189 }
 0x1b0   :  { %v193_v51 = vsub.f32 %v122_v33, %v190_v50 }
 0x1b2   :  { %v396_v52 = vpop.eup %395  ;;  %v196_v53 = vmul.f32 1.442695, %v193_v51 }
 0x1b3   :  { %v198_v54 = vsel %vm552_vm9, %v396_v52, 0.0 }
 0x1b4   :  { %397 = vpow2.f32 %v196_v53  ;;  %208 = vadd.xlane.f32.xlu2 %v198_v54 }
 0x1b5   :  { %399 = vpow2.f32 %v148_v62 }
 0x1b6   :  { %401 = vpow2.f32 %v150_v63 }
 0x1b7   :  { %403 = vrcp.f32 %v310_v0 }
 0x1ba   :  { %v398_v55 = vpop.eup %397 }
 0x1bb   :  { %v199_v56 = vsel %vm537_vm4, %v398_v55, 0.0  ;;  %v400_v1 = vpop.eup %399 }
 0x1bc   :  { %210 = vadd.xlane.f32.xlu0 %v199_v56  ;;  %v206_v3 = vmul.f32 %v400_v1, %v204_v2  ;;  %v402_v6 = vpop.eup %401 }
 0x1bd   :  { %v404_v8 = vpop.eup %403  ;;  %v207_v11 = vmul.f32 %v402_v6, %v205_v9 }
 0x1be   :  { %v313_v10 = vmul.f32 %v404_v8, %v310_v0  ;;  %vm318_vm12 = vweird.f32 %v404_v8 }
 0x1bf   :  { %vm319_vm13 = vmor %vm317_vm11, %vm318_vm12 }
 0x1c0   :  { %v314_v14 = vsub.f32 1.0, %v313_v10 }
 0x1c2   :  { %v315_v18 = vmul.f32 %v404_v8, %v314_v14 }
 0x1c4   :  { %220 = vadd.xlane.f32.xlu0 %v218_v57  ;;  %v316_v25 = vadd.f32 %v404_v8, %v315_v18 }
 0x1c6   :  { %v320_v32 = vsel %vm319_vm13, %v404_v8, %v316_v25 }
 0x1c7   :  { %v325_v37 = vsel %vm322_vm14, %v324_v28, %v320_v32 }
 0x1cc   :  { %222 = vadd.xlane.f32.xlu0 %v219_v58 }
 0x1da   :  { %v233_v60 = vpop.xlane.xlu1 %232 }
 0x1db   :  { %v235_v61 = vadd.f32 %v233_v60, %v229_v59 }
 0x1dd   :  { %237 = vst.msk [vmem:[#allocation5 + $0x8] sm:$0xff] %vm129_vm6, %v235_v61 }
 0x1e4   :  { %v311_v7 = vld [vmem:[#allocation5 + $0x8] sm:$0xff] }
 0x1e5   :  { %405 = vrcp.f32 %v311_v7  ;;  %vm332_vm15 = vweird.f32 %v311_v7  ;;  %v338_v36 = vand.u32 2147483648, %v311_v7  ;;  %v336_v42 = vand.u32 2147483647, %v311_v7 }
 0x1e7   :  { %v339_v45 = vor.u32 1.1754944e-38, %v338_v36  ;;  %vm337_vm2 = vcmp.eq.f32.partialorder %v336_v42, 8.507059e+37 }
 0x1eb   :  { %v406_v16 = vpop.eup %405 }
 0x1ec   :  { %v328_v19 = vmul.f32 %v406_v16, %v311_v7  ;;  %vm333_vm0 = vweird.f32 %v406_v16 }
 0x1ed   :  { %vm334_vm1 = vmor %vm332_vm15, %vm333_vm0 }
 0x1ee   :  { %v329_v23 = vsub.f32 1.0, %v328_v19 }
 0x1f0   :  { %v330_v30 = vmul.f32 %v406_v16, %v329_v23 }
 0x1f2   :  { %v331_v41 = vadd.f32 %v406_v16, %v330_v30 }
 0x1f4   :  { %v335_v48 = vsel %vm334_vm1, %v406_v16, %v331_v41 }
 0x1f5   :  { %v340_v50 = vsel %vm337_vm2, %v339_v45, %v335_v48 }
 0x227   :  { %v209_v4 = vpop.xlane.xlu2 %208 }
 0x228   :  { %v212_v5 = vadd.f32 %v209_v4, %v206_v3 }
 0x22a   :  { %214 = vst.msk [vmem:[#allocation3] sm:$0xff] %vm129_vm6, %v212_v5 }
 0x22f   :  { %v211_v12 = vpop.xlane.xlu0 %210 }
 0x230   :  { %v213_v13 = vadd.f32 %v211_v12, %v207_v11 }
 0x231   :  { %v300_v15 = vld [vmem:[#allocation3] sm:$0xff] }
 0x232   :  { %215 = vst.msk [vmem:[#allocation3 + $0x8] sm:$0xff] %vm129_vm6, %v213_v13  ;;  %407 = vlog2.f32 %v300_v15 }
 0x237   :  { %v221_v20 = vpop.xlane.xlu0 %220 }
 0x238   :  { %v224_v21 = vadd.f32 %v221_v20, %v216_v17  ;;  %v408_v27 = vpop.eup %407 }
 0x239   :  { %v301_v24 = vld [vmem:[#allocation3 + $0x8] sm:$0xff]  ;;  %v303_v31 = vmul.f32 0.6931472, %v408_v27 }
 0x23a   :  { %226 = vst.msk [vmem:[#allocation4] sm:$0xff] %vm129_vm6, %v224_v21  ;;  %409 = vlog2.f32 %v301_v24 }
 0x23b   :  { %v306_v39 = vadd.f32 %v303_v31, %v298_v35 }
 0x23f   :  { %v223_v33 = vpop.xlane.xlu0 %222 }
 0x240   :  { %v225_v34 = vadd.f32 %v223_v33, %v217_v29  ;;  %v410_v43 = vpop.eup %409 }
 0x241   :  { %v308_v38 = vld [vmem:[#allocation4] sm:$0xff]  ;;  %v305_v46 = vmul.f32 0.6931472, %v410_v43 }
 0x242   :  { %v326_v40 = vmul.f32 %v325_v37, %v308_v38  ;;  %227 = vst.msk [vmem:[#allocation4 + $0x8] sm:$0xff] %vm129_vm6, %v225_v34 }
 0x243   :  { %v307_v52 = vadd.f32 %v305_v46, %v299_v49 }
 0x244   :  { %v342_v44 = vsub.f32 %v326_v40, %v306_v39 }
 0x246   :  { %v344_v47 = vmul.f32 -1.0, %v342_v44 }
 0x248   :  { %346 = vst.msk [vmem:[%s582_s4] sm:$0xff] %vm129_vm6, %v344_v47 }
 0x249   :  { %v309_v51 = vld [vmem:[#allocation4 + $0x8] sm:$0xff] }
 0x24a   :  { %v341_v53 = vmul.f32 %v340_v50, %v309_v51 }
 0x24c   :  { %v343_v54 = vsub.f32 %v341_v53, %v307_v52 }
 0x24e   :  { %v345_v55 = vmul.f32 -1.0, %v343_v54 }
 0x250   :  { %347 = vst.msk [vmem:[%s582_s4 + $0x8] sm:$0xff] %vm129_vm6, %v345_v55 }

</bundles_post_ra>
